<compile_context>
chip_gen: v7x
topology: tpu7x:2x2x1
jax: 0.10.0
libtpu: 0.0.40
codegen_flags: <defaults>
</compile_context>

<pallas_src>
import jax
import jax.numpy as jnp
from jax.experimental import pallas as pl
from jax.experimental.pallas import tpu as pltpu


def _rmsnorm_kernel(x_ref, w_ref, o_ref, *, eps, in_dtype):
    # float32 compute mirrors `hidden_states.to(torch.float32)`.
    x = x_ref[...].astype(jnp.float32)                  # (tile_rows, hidden)
    var = jnp.mean(x * x, axis=-1, keepdims=True)       # (tile_rows, 1)
    normed = x * jax.lax.rsqrt(var + eps)                # float32
    # `self.weight * hidden_states.to(input_dtype)`: cast back to the input
    # dtype first, multiply by the weight in its own dtype (promotes to the
    # output dtype), single final cast into the output ref.
    o_ref[...] = (w_ref[...] * normed.astype(in_dtype)).astype(o_ref.dtype)


def _align_up(x, m):
    return ((x + m - 1) // m) * m


def _tpu_vmem_and_cores():
    """(physical VMEM bytes per TensorCore, TensorCores per chip), with fallbacks."""
    vmem_bytes = None
    try:
        info = pltpu.get_tpu_info()
        vmem_bytes = getattr(info, "vmem_capacity_bytes", None)
    except Exception:
        vmem_bytes = None
    kind = ""
    try:
        kind = jax.devices()[0].device_kind.lower()
    except Exception:
        kind = ""
    is_v7 = ("v7" in kind) or ("tpu7" in kind)
    num_tc = 2 if is_v7 else 1                       # v5e / v6e: 1 TC; v7x: 2 TCs
    if vmem_bytes is None:
        vmem_bytes = (64 if is_v7 else 128) * 1024 * 1024
    return int(vmem_bytes), num_tc


def _choose_tiling(rows, hidden, in_dtype, out_dtype):
    """Pick (row_tile, vmem_limit_bytes): generation- and temp-aware."""
    in_bytes = jnp.dtype(in_dtype).itemsize
    out_bytes = jnp.dtype(out_dtype).itemsize
    # Sublane packing: 8 rows for 4-byte, 16 for 2-byte, 32 for 1-byte inputs.
    sublane = max(8, 32 // max(in_bytes, 1))

    vmem_phys, num_tc = _tpu_vmem_and_cores()
    # Scoped VMEM limit: 3/4 of physical, capped at 64 MiB
    # (-> 64 MiB on 128-MiB v5e/v6e, 48 MiB on 64-MiB v7x).
    vmem_limit = int(min(64 * 1024 * 1024, (vmem_phys * 3) // 4))
    # Tile budget: leave headroom under the scoped limit for Mosaic internal
    # scratch and the (tiny) weight buffer.
    vmem_budget = (vmem_limit * 3) // 4

    # Per-row cost: double-buffered input + output tiles plus ~2 f32-sized
    # compute temporaries (the upcast block and the x*x / normalized block).
    per_row_bytes = hidden * ((in_bytes + out_bytes) * 2 + 8)
    max_rows = max(sublane, vmem_budget // max(per_row_bytes, 1))
    max_rows = min(max_rows, 1024)                   # diminishing returns past ~1K rows
    max_rows = max((max_rows // sublane) * sublane, sublane)

    rows_aligned = _align_up(rows, sublane)

    if num_tc > 1 and rows > sublane:
        # v7x: keep the ("parallel",) grid length a multiple of the TC count so
        # both TensorCores stream a (near-)equal number of blocks.
        steps = pl.cdiv(rows, max_rows)
        steps = _align_up(steps, num_tc)
        tile = _align_up(pl.cdiv(rows, steps), sublane)
        tile = min(tile, max_rows)
    else:
        # v5e / v6e: single TensorCore -> grid is a serial loop; run in as few
        # steps as possible (small inputs collapse to a single grid step).
        tile = min(max_rows, rows_aligned)

    return max(tile, sublane), vmem_limit


def qwen3_rmsnorm(hidden_states, weight, eps=1e-6, *, row_tile=None,
                  xla_fallback_rows=0):
    """Pallas RMSNorm. hidden_states: (..., hidden); weight: (hidden,).

    `xla_fallback_rows` (default 0 = disabled) lets decode-sized inputs skip
    the pallas_call fixed cost and use a plain fused XLA op instead.
    """
    in_dtype = hidden_states.dtype
    out_dtype = jnp.promote_types(in_dtype, weight.dtype)  # matches torch semantics
    orig_shape = hidden_states.shape
    hidden = orig_shape[-1]
    rows = 1
    for d in orig_shape[:-1]:
        rows *= d

    if rows <= xla_fallback_rows:
        # Small-input fast path (semantically identical).
        return qwen3_rmsnorm_reference(hidden_states, weight, eps).astype(out_dtype)

    x2d = hidden_states.reshape(rows, hidden)
    w2d = weight.reshape(1, hidden)                         # keep native weight dtype

    auto_tile, vmem_limit = _choose_tiling(rows, hidden, in_dtype, out_dtype)
    tile = row_tile if row_tile is not None else auto_tile
    grid = (pl.cdiv(rows, tile),)

    # TODO(synk): for hidden < 128 the lane dim is under-filled; real Qwen3
    # hidden sizes are lane-aligned, so no extra folding is done here.

    kernel = lambda x_ref, w_ref, o_ref: _rmsnorm_kernel(
        x_ref, w_ref, o_ref, eps=eps, in_dtype=in_dtype
    )

    out2d = pl.pallas_call(
        kernel,
        out_shape=jax.ShapeDtypeStruct((rows, hidden), out_dtype),
        grid_spec=pltpu.PrefetchScalarGridSpec(
            num_scalar_prefetch=0,
            grid=grid,
            in_specs=[
                pl.BlockSpec((tile, hidden), lambda i: (i, 0)),
                # Constant index_map -> Pallas skips re-DMA of the weight tile
                # after the first grid step.
                pl.BlockSpec((1, hidden), lambda i: (0, 0)),
            ],
            out_specs=pl.BlockSpec((tile, hidden), lambda i: (i, 0)),
        ),
        compiler_params=pltpu.CompilerParams(
            dimension_semantics=("parallel",),
            vmem_limit_bytes=vmem_limit,
        ),
    )(x2d, w2d)

    return out2d.reshape(orig_shape[:-1] + (hidden,))


def qwen3_rmsnorm_reference(hidden_states, weight, eps=1e-6):
    """Pure-JAX reference mirroring the PyTorch forward."""
    in_dtype = hidden_states.dtype
    x = hidden_states.astype(jnp.float32)
    var = jnp.mean(x * x, axis=-1, keepdims=True)
    x = x * jax.lax.rsqrt(var + eps)
    return weight * x.astype(in_dtype)


if __name__ == "__main__":
    key = jax.random.PRNGKey(0)
    batch, seq, hidden = 2, 8, 32
    eps = 1e-6

    kx, kw = jax.random.split(key)
    x = jax.random.normal(kx, (batch, seq, hidden), dtype=jnp.float32)

    # Module-faithful init: nn.Parameter(torch.ones(hidden_size)).
    weight_ones = jnp.ones((hidden,), dtype=jnp.float32)
    out = jax.block_until_ready(qwen3_rmsnorm(x, weight_ones, eps))
    ref = qwen3_rmsnorm_reference(x, weight_ones, eps)
    assert out.shape == ref.shape, (out.shape, ref.shape)
    assert out.dtype == ref.dtype, (out.dtype, ref.dtype)
    assert jnp.allclose(out, ref, atol=1e-5, rtol=1e-5), "mismatch vs reference (ones weight)"

    # Extra check with a non-trivial weight to exercise the scale multiply.
    weight_rand = (1.0 + 0.1 * jax.random.normal(kw, (hidden,), dtype=jnp.float32))
    out2 = jax.block_until_ready(qwen3_rmsnorm(x, weight_rand, eps))
    ref2 = qwen3_rmsnorm_reference(x, weight_rand, eps)
    assert jnp.allclose(out2, ref2, atol=1e-5, rtol=1e-5), "mismatch vs reference (rand weight)"

    print("KERNEL_OK")
</pallas_src>

<mosaic_0001>
module attributes {stable_mosaic.version = 11 : i64} {
  func.func @_lambda_(%arg0: i32, %arg1: memref<16x32xf32, #tpu.memory_space<vmem>>, %arg2: memref<1x32xf32, #tpu.memory_space<vmem>>, %arg3: memref<16x32xf32, #tpu.memory_space<vmem>>) attributes {dimension_semantics = [#tpu.dimension_semantics<parallel>], iteration_bounds = array<i64: 1>, scalar_prefetch = 0 : i64, scratch_operands = 0 : i64, tpu.core_type = #tpu.core_type<tc>, window_params = [{transform_indices = @transform_0, window_bounds = array<i64: 16, 32>}, {pipeline_mode = #tpu.pipeline_mode<synchronous>, transform_indices = @transform_1, window_bounds = array<i64: 1, 32>}, {transform_indices = @transform_2, window_bounds = array<i64: 16, 32>}]} {
    %c0 = arith.constant 0 : index
    %c0_0 = arith.constant 0 : index
    %0 = vector.load %arg1[%c0, %c0_0] : memref<16x32xf32, #tpu.memory_space<vmem>>, vector<16x32xf32>
    %1 = arith.mulf %0, %0 : vector<16x32xf32>
    %cst = arith.constant dense<0.000000e+00> : vector<16xf32>
    %2 = vector.multi_reduction <add>, %1, %cst [1] : vector<16x32xf32> to vector<16xf32>
    %3 = vector.shape_cast %2 : vector<16xf32> to vector<16x1xf32>
    %cst_1 = arith.constant 3.200000e+01 : f32
    %4 = vector.broadcast %cst_1 : f32 to vector<16x1xf32>
    %5 = arith.divf %3, %4 : vector<16x1xf32>
    %cst_2 = arith.constant 9.99999997E-7 : f32
    %6 = vector.broadcast %cst_2 : f32 to vector<16x1xf32>
    %7 = arith.addf %5, %6 : vector<16x1xf32>
    %8 = math.rsqrt %7 : vector<16x1xf32>
    %9 = vector.broadcast %8 : vector<16x1xf32> to vector<16x32xf32>
    %10 = arith.mulf %0, %9 : vector<16x32xf32>
    %c0_3 = arith.constant 0 : index
    %c0_4 = arith.constant 0 : index
    %11 = vector.load %arg2[%c0_3, %c0_4] : memref<1x32xf32, #tpu.memory_space<vmem>>, vector<1x32xf32>
    %12 = vector.broadcast %11 : vector<1x32xf32> to vector<16x32xf32>
    %13 = arith.mulf %12, %10 : vector<16x32xf32>
    %c0_5 = arith.constant 0 : index
    %c0_6 = arith.constant 0 : index
    %14 = vector.load %arg3[%c0_5, %c0_6] : memref<16x32xf32, #tpu.memory_space<vmem>>, vector<16x32xf32>
    tpu.vector_store %arg3[%c0_5, %c0_6], %13 {strides = array<i32>} : memref<16x32xf32, #tpu.memory_space<vmem>>, vector<16x32xf32>,
    return
  }
  func.func @transform_0(%arg0: i32) -> (i32, i32) {
    %c0_i32 = arith.constant 0 : i32
    %c0_i32_0 = arith.constant 0 : i32
    return %arg0, %c0_i32 : i32, i32
  }
  func.func @transform_1(%arg0: i32) -> (i32, i32) {
    %c0_i32 = arith.constant 0 : i32
    %c0_i32_0 = arith.constant 0 : i32
    %c0_i32_1 = arith.constant 0 : i32
    return %c0_i32, %c0_i32_0 : i32, i32
  }
  func.func @transform_2(%arg0: i32) -> (i32, i32) {
    %c0_i32 = arith.constant 0 : i32
    %c0_i32_0 = arith.constant 0 : i32
    return %arg0, %c0_i32 : i32, i32
  }
}

</mosaic_0001>

<bundles_post_ra>
// kernel: tpu_custom_call.1
= control target key start
LH: loop header
LB: loop body
LE: loop exit
PB: predicated region body
PF: predicated region fallthrough
CT: control target
= control target key end

     0   :  { %7 = vsyncpa [#allocation3], 0  ;;  %s235_s0 = inlined_call_operand.hbm [shape: f32[16,32], index: 0, kind: input, shape index: {}]   ;;  %s236_s1 = inlined_call_operand.hbm [shape: f32[1,32], index: 1, kind: input, shape index: {}]   ;;  %s237_s2 = inlined_call_operand.hbm [shape: f32[16,32], index: 2, kind: output, shape index: {}]  }
   0x1   :  { %8 = vsyncpa [#allocation6], 0 }
   0x2   :  { %9 = vsyncpa [#allocation4], 0  ;;  %s169_s9 = smov [#allocation2]   ;;  %s97_s13 = scalar_lea.hbm %s235_s0, 256 }
   0x3   :  { %s15_s10 = sshll.u32 %s169_s9, 4  ;;  %p98_p0 = scmp.ne.s32.totalorder %s235_s0, %s97_s13  ;;  %s16_s10 = int_to_ptr.vmem [resolvable:$true] %s15_s10 }
   0x4   :  { %p101_p1 = scmp.lt.u32.totalorder %s97_s13, %s235_s0 }
   0x6   :  { %p103_p2 = pnand %p101_p1, %p98_p0 }
   0x8   :  { %106 = shalt.err (!%p103_p2)
}
   0x9   :  { %s107_s18 = scalar_lea.vmem %s16_s10, 256  ;;  %p112_p4 = scmp.lt.s32.totalorder %s16_s10, %s16_s10 }
   0xa   :  { %p108_p3 = scmp.ne.s32.totalorder %s16_s10, %s107_s18  ;;  %p113_p5 = scmp.lt.s32.totalorder %s107_s18, %s107_s18 }
   0xc   :  { %p114_p6 = por %p113_p5, %p112_p4 }
   0xe   :  { %p115_p7 = pnand %p114_p6, %p108_p3 }
  0x10   :  { %118 = shalt.err (!%p115_p7)
}
  0x11   :  { %s170_s19 = smov 128   ;;  %s171_s20 = smov 8  }
  0x12   :  { %21 = dma.hbm_to_vmem [thread:$0]  %s235_s0, 256, %s16_s10, [#allocation3], %s170_s19, %s170_s19, %s171_s20  }
  0x13   :  { %s172_s23 = smov [#allocation5]   ;;  %s119_s27 = scalar_lea.hbm %s236_s1, 16 }
  0x14   :  { %s28_s24 = sshll.u32 %s172_s23, 4  ;;  %p120_p8 = scmp.ne.s32.totalorder %s236_s1, %s119_s27  ;;  %s29_s24 = int_to_ptr.vmem [resolvable:$true] %s28_s24 }
  0x15   :  { %p123_p9 = scmp.lt.u32.totalorder %s119_s27, %s236_s1 }
  0x17   :  { %p125_p10 = pnand %p123_p9, %p120_p8 }
  0x19   :  { %128 = shalt.err (!%p125_p10)
}
  0x1a   :  { %s129_s4 = scalar_lea.vmem %s29_s24, 16  ;;  %s133_s0 = scalar_lea.vmem %s29_s24, 32 }
  0x1b   :  { %p130_p11 = scmp.ne.s32.totalorder %s29_s24, %s129_s4  ;;  %p134_p12 = scmp.lt.s32.totalorder %s29_s24, %s29_s24 }
  0x1c   :  { %p135_p13 = scmp.lt.s32.totalorder %s133_s0, %s129_s4 }
  0x1e   :  { %p136_p0 = por %p135_p13, %p134_p12 }
  0x20   :  { %p137_p1 = pnand %p136_p0, %p130_p11 }
  0x22   :  { %140 = shalt.err (!%p137_p1)
}
  0x23   :  { %31 = dma.hbm_to_vmem [thread:$0]  %s236_s1, 16, %s29_s24, [#allocation6]  }
  0x24   :  { %163 = dma.done.wait [#allocation3], 256  }
  0x25   :  { %164 = vsyncadd [#allocation3], 4294967040 }
  0x26   :  { %165 = dma.done.wait [#allocation6], 16  }
  0x27   :  { %166 = vsyncadd [#allocation6], 4294967280  ;;  %v38_v0 = vld [vmem:[#allocation2] sm:$0xff]  ;;  %vm42_vm0 = vcmask 261120   ;;  %v39_v1 = vld [vmem:[#allocation2 + $0x8] sm:$0xff]  ;;  %s173_s1 = smov [#allocation7]  }
  0x28   :  { %v40_v2 = vmul.f32 %v38_v0, %v38_v0  ;;  %v41_v3 = vmul.f32 %v39_v1, %v39_v1  ;;  %v87_v13 = vld [vmem:[#allocation5] ss:$0 sm:$0xff]  ;;  %s74_s7 = sshll.u32 %s173_s1, 4  ;;  %s75_s7 = int_to_ptr.vmem [resolvable:$true] %s74_s7 }
  0x29   :  { %s141_s8 = scalar_lea.vmem %s75_s7, 256  ;;  %p146_p3 = scmp.lt.s32.totalorder %s75_s7, %s75_s7 }
  0x2a   :  { %v43_v4 = vsel %vm42_vm0, %v40_v2, 0.0  ;;  %v46_v5 = vsel %vm42_vm0, %v41_v3, 0.0  ;;  %p142_p2 = scmp.ne.s32.totalorder %s75_s7, %s141_s8  ;;  %p147_p4 = scmp.lt.s32.totalorder %s141_s8, %s141_s8 }
  0x2b   :  { %44 = vadd.xlane.f32.xlu0 %v43_v4 }
  0x2c   :  { %p148_p5 = por %p147_p4, %p146_p3 }
  0x2e   :  { %p149_p6 = pnand %p148_p5, %p142_p2 }
  0x2f   :  { %47 = vadd.xlane.f32.xlu0 %v46_v5 }
  0xb8   :  { %v45_v6 = vpop.xlane.xlu0 %44 }
  0xb9   :  { %v50_v7 = vmul.f32 0.03125, %v45_v6 }
  0xbb   :  { %v52_v8 = vadd.f32 1e-06, %v50_v7 }
  0xbc   :  { %v48_v9 = vpop.xlane.xlu0 %47 }
  0xbd   :  { %93 = vrsqrt.f32 %v52_v8  ;;  %v51_v10 = vmul.f32 0.03125, %v48_v9 }
  0xbf   :  { %v53_v11 = vadd.f32 1e-06, %v51_v10 }
  0xc1   :  { %95 = vrsqrt.f32 %v53_v11 }
  0xc7   :  { %v94_v12 = vpop.eup %93 }
  0xc8   :  { %v56_v14 = vmul.f32 %v94_v12, %v38_v0 }
  0xca   :  { %v65_v15 = vmul.f32 %v87_v13, %v56_v14 }
  0xcb   :  { %v96_v16 = vpop.eup %95 }
  0xcc   :  { %v57_v17 = vmul.f32 %v96_v16, %v39_v1  ;;  %67 = vst.msk [vmem:[#allocation7] sm:$0xff] %vm42_vm0, %v65_v15 }
  0xce   :  { %v66_v18 = vmul.f32 %v87_v13, %v57_v17 }
  0xd0   :  { %68 = vst.msk [vmem:[#allocation7 + $0x8] sm:$0xff] %vm42_vm0, %v66_v18 }
  0xd1   :  { %152 = shalt.err (!%p149_p6)
}
  0xd2   :  { %s153_s11 = scalar_lea.hbm %s237_s2, 256 }
  0xd3   :  { %p154_p7 = scmp.ne.s32.totalorder %s237_s2, %s153_s11  ;;  %p157_p8 = scmp.lt.u32.totalorder %s153_s11, %s237_s2 }
  0xd5   :  { %p159_p9 = pnand %p157_p8, %p154_p7 }
  0xd7   :  { %162 = shalt.err (!%p159_p9)
}
  0xd8   :  { %80 = dma.vmem_to_hbm [thread:$0]  %s75_s7, 256, %s237_s2, [#allocation4], %s170_s19, %s170_s19, %s171_s20  }
  0xd9   :  { %167 = dma.done.wait [#allocation4], 256  }
  0xda   :  { %168 = vsyncadd [#allocation4], 4294967040 }
  0xdb   :  { %84 = vsyncpa [#allocation3], 1 }
  0xdc   :  { %85 = vsyncpa [#allocation6], 1 }
  0xdd   :  { %86 = vsyncpa [#allocation4], 1 }

</bundles_post_ra>
